<compile_context>
chip_gen: v5e
topology: v5e:2x2
jax: 0.10.0
libtpu: 0.0.40
codegen_flags: <defaults>
</compile_context>

<pallas_src>
import jax
import jax.numpy as jnp
from jax import lax
from jax.experimental import pallas as pl
from jax.experimental.pallas import tpu as pltpu


def _selfattn_kernel(x_ref, wq_ref, bq_ref, wk_ref, bk_ref, wv_ref, bv_ref,
                     gamma_ref, o_ref, k_scr, v_scr):
    f32 = jnp.float32
    bf16 = jnp.bfloat16
    iq = pl.program_id(1)
    tile_q = o_ref.shape[-1]

    # K / V projections are shared by every query tile of this batch element:
    # compute them once (first query tile) into bf16 VMEM scratch and reuse.
    @pl.when(iq == 0)
    def _():
        xb = x_ref[...].astype(bf16)                                # (C, HW)
        k = jnp.dot(wk_ref[...], xb, preferred_element_type=f32) + bk_ref[...]
        v = jnp.dot(wv_ref[...], xb, preferred_element_type=f32) + bv_ref[...]
        k_scr[...] = k.astype(bf16)                                 # (C8, HW)
        v_scr[...] = v.astype(bf16)                                 # (C,  HW)

    # Query tile for this grid step, sliced out of the resident (C, HW) block
    # (no separate HBM streams for the q path or the residual).
    start = pl.multiple_of(iq * tile_q, tile_q)
    x_tile = x_ref[:, pl.ds(start, tile_q)]                         # (C, TQ)

    # Channel-major q so the matmul outputs are lane-dense.
    q = (jnp.dot(wq_ref[...], x_tile.astype(bf16),
                 preferred_element_type=f32)
         + bq_ref[...])                                             # (C8, TQ)

    # s[i, j] = sum_c q[c, i] * k[c, j]  (contract the C8 axis) -> (TQ, HW)
    s = lax.dot_general(q.astype(bf16), k_scr[...],
                        (((0,), (0,)), ((), ())),
                        preferred_element_type=f32)

    # Numerically stable softmax over the key axis (lanes), kept in f32.
    m = jnp.max(s, axis=-1, keepdims=True)
    e = jnp.exp(s - m)
    p = e * pl.reciprocal(jnp.sum(e, axis=-1, keepdims=True), approx=True)

    # out[c, i] = sum_j v[c, j] * p[i, j]  -> lane-dense (C, TQ) tile.
    out = lax.dot_general(v_scr[...], p.astype(bf16),
                          (((1,), (1,)), ((), ())),
                          preferred_element_type=f32)

    o_ref[...] = (gamma_ref[0] * out
                  + x_tile.astype(f32)).astype(o_ref.dtype)


def _vmem_bytes_estimate(C, C8, HW, tile_q, x_itemsize, out_itemsize):
    """Rough per-grid-step VMEM footprint: blocks + scratch + temporaries."""
    BF, F32 = 2, 4
    fixed = 2 * C * HW * x_itemsize                       # x block, 2 buffers
    fixed += (C8 + C) * HW * BF                           # K / V bf16 scratch
    fixed += 2 * ((C8 + C) * C * BF + (2 * C8 + C) * F32)  # weights + biases
    per = 3 * tile_q * HW * F32                           # s / e / p temporaries
    per += tile_q * HW * BF                               # p cast to bf16
    per += 2 * C * tile_q * out_itemsize                  # output block, 2 bufs
    per += C * tile_q * (x_itemsize + BF + F32) + C8 * tile_q * F32
    return fixed + per


def _vmem_capacity_bytes():
    try:
        info = pltpu.get_tpu_info()
        cap = getattr(info, "vmem_capacity_bytes", None)
        if cap:
            return int(cap)
    except Exception:
        pass
    return 64 * 1024 * 1024        # conservative (v7x-sized) fallback


def self_attention(x, w_query, b_query, w_key, b_key, w_value, b_value, gamma,
                   *, tile_q=None):
    """Forward of the PyTorch `selfattention` module.

    x:        (B, C, H, W)
    w_query:  (C//8, C, 1, 1)   b_query: (C//8,)
    w_key:    (C//8, C, 1, 1)   b_key:   (C//8,)
    w_value:  (C,    C, 1, 1)   b_value: (C,)
    gamma:    (1,)
    """
    B, C, H, W = x.shape
    HW = H * W
    C8 = w_query.shape[0]
    f32, bf16 = jnp.float32, jnp.bfloat16
    x_item = jnp.dtype(x.dtype).itemsize

    # Per-generation VMEM budget (v7x: 64 MiB physical, v5e/v6e: 128 MiB).
    vmem_cap = _vmem_capacity_bytes()
    vmem_limit = int(min(vmem_cap * 0.85, 100 * 1024 * 1024))
    budget = int(vmem_limit * 0.9)

    if tile_q is None:
        cands = [t for t in (2048, 1024, 512, 256, 128) if HW % t == 0]
        tile_q = HW if not cands else cands[-1]   # best-effort fallback
        for t in cands:
            if _vmem_bytes_estimate(C, C8, HW, t, x_item, x_item) <= budget:
                tile_q = t
                break
    assert HW % tile_q == 0, (HW, tile_q)
    nq = HW // tile_q

    # Contiguous reshape only — x stays in its native dtype; no transpose.
    x_chw = x.reshape(B, C, HW)                              # (B, C, HW)

    wq_m = w_query.reshape(C8, C).astype(bf16)               # (C8, C)
    wk_m = w_key.reshape(C8, C).astype(bf16)                 # (C8, C)
    wv_m = w_value.reshape(C, C).astype(bf16)                # (C,  C)
    bq_c = b_query.reshape(C8, 1).astype(f32)
    bk_c = b_key.reshape(C8, 1).astype(f32)
    bv_c = b_value.reshape(C, 1).astype(f32)
    gamma_s = gamma.reshape(1).astype(f32)

    sq = pl.Squeezed()
    out = pl.pallas_call(
        _selfattn_kernel,
        out_shape=jax.ShapeDtypeStruct((B, C, HW), x.dtype),
        grid_spec=pltpu.PrefetchScalarGridSpec(
            num_scalar_prefetch=0,
            grid=(B, nq),
            in_specs=[
                # Full (C, HW) block; its block index is constant over iq so it
                # is fetched once per batch element and reused by every tile.
                pl.BlockSpec((sq, C, HW), lambda b, i: (b, 0, 0)),
                pl.BlockSpec((C8, C), lambda b, i: (0, 0)),
                pl.BlockSpec((C8, 1), lambda b, i: (0, 0)),
                pl.BlockSpec((C8, C), lambda b, i: (0, 0)),
                pl.BlockSpec((C8, 1), lambda b, i: (0, 0)),
                pl.BlockSpec((C, C), lambda b, i: (0, 0)),
                pl.BlockSpec((C, 1), lambda b, i: (0, 0)),
                pl.BlockSpec(memory_space=pltpu.MemorySpace.SMEM),
            ],
            out_specs=pl.BlockSpec((sq, C, tile_q), lambda b, i: (b, 0, i)),
            scratch_shapes=[
                pltpu.VMEM((C8, HW), bf16),   # K, persists across query tiles
                pltpu.VMEM((C, HW), bf16),    # V, persists across query tiles
            ],
        ),
        compiler_params=pltpu.CompilerParams(
            dimension_semantics=("parallel", "arbitrary"),
            vmem_limit_bytes=vmem_limit),
    )(x_chw, wq_m, bq_c, wk_m, bk_c, wv_m, bv_c, gamma_s)

    # (B, C, HW) is already NCHW-contiguous: reshape only, no transpose/cast.
    return out.reshape(B, C, H, W)


def _reference(x, w_query, b_query, w_key, b_key, w_value, b_value, gamma):
    # Pure-JAX reference matching the PyTorch forward, for validation.
    B, C, H, W = x.shape
    HW = H * W
    C8 = w_query.shape[0]
    hp = lax.Precision.HIGHEST
    xf = x.reshape(B, C, HW)
    q = jnp.einsum('oc,bcs->bos', w_query.reshape(C8, C), xf,
                   precision=hp) + b_query[None, :, None]
    k = jnp.einsum('oc,bcs->bos', w_key.reshape(C8, C), xf,
                   precision=hp) + b_key[None, :, None]
    v = jnp.einsum('oc,bcs->bos', w_value.reshape(C, C), xf,
                   precision=hp) + b_value[None, :, None]
    attn = jnp.einsum('bci,bcj->bij', q, k, precision=hp)       # (B, HW, HW)
    attn = jax.nn.softmax(attn, axis=-1)
    out = jnp.einsum('bcj,bij->bci', v, attn, precision=hp)     # (B, C, HW)
    return (gamma[0] * out + xf).reshape(B, C, H, W)


if __name__ == "__main__":
    # selfattention(in_channels=32): query/key are Conv2d(32, 4, 1), value is
    # Conv2d(32, 32, 1).  Small deterministic shapes.
    B, C, H, W = 2, 32, 16, 16
    C8 = C // 8

    key = jax.random.PRNGKey(0)
    ks = jax.random.split(key, 7)
    x = jax.random.normal(ks[0], (B, C, H, W), dtype=jnp.float32)

    # PyTorch Conv2d default init: U(-1/sqrt(fan_in), 1/sqrt(fan_in)), fan_in=C.
    bound = 1.0 / (C ** 0.5)

    def u(k, shape):
        return jax.random.uniform(k, shape, minval=-bound, maxval=bound,
                                  dtype=jnp.float32)

    w_query, b_query = u(ks[1], (C8, C, 1, 1)), u(ks[2], (C8,))
    w_key,   b_key   = u(ks[3], (C8, C, 1, 1)), u(ks[4], (C8,))
    w_value, b_value = u(ks[5], (C, C, 1, 1)),  u(ks[6], (C,))
    # The module initializes gamma to 0 (which would trivially return x); use a
    # nonzero value so the attention path is actually exercised by this test.
    gamma = jnp.array([0.5], dtype=jnp.float32)

    ref = _reference(x, w_query, b_query, w_key, b_key, w_value, b_value, gamma)

    # Multi-tile path (exercises the K/V scratch carry across query tiles)...
    out_tiled = jax.block_until_ready(
        self_attention(x, w_query, b_query, w_key, b_key, w_value, b_value,
                       gamma, tile_q=128))
    # ...and the budget-driven default tile size.
    out_auto = jax.block_until_ready(
        self_attention(x, w_query, b_query, w_key, b_key, w_value, b_value,
                       gamma))

    for out in (out_tiled, out_auto):
        assert out.shape == x.shape, out.shape
        max_err = float(jnp.max(jnp.abs(out - ref)))
        # bf16 MXU operands with f32 accumulation vs. an all-f32 reference.
        assert jnp.allclose(out, ref, atol=3e-2, rtol=3e-2), max_err
    print("KERNEL_OK")
</pallas_src>

<mosaic_0001>
module attributes {stable_mosaic.version = 11 : i64} {
  func.func @_selfattn_kernel(%arg0: i32, %arg1: i32, %arg2: memref<1x32x256xf32, #tpu.memory_space<vmem>>, %arg3: memref<4x32xbf16, #tpu.memory_space<vmem>>, %arg4: memref<4x1xf32, #tpu.memory_space<vmem>>, %arg5: memref<4x32xbf16, #tpu.memory_space<vmem>>, %arg6: memref<4x1xf32, #tpu.memory_space<vmem>>, %arg7: memref<32x32xbf16, #tpu.memory_space<vmem>>, %arg8: memref<32x1xf32, #tpu.memory_space<vmem>>, %arg9: memref<1xf32, #tpu.memory_space<smem>>, %arg10: memref<1x32x128xf32, #tpu.memory_space<vmem>>, %arg11: memref<4x256xbf16, #tpu.memory_space<vmem>>, %arg12: memref<32x256xbf16, #tpu.memory_space<vmem>>) attributes {dimension_semantics = [#tpu.dimension_semantics<parallel>, #tpu.dimension_semantics<arbitrary>], iteration_bounds = array<i64: 2, 2>, scalar_prefetch = 0 : i64, scratch_operands = 2 : i64, tpu.core_type = #tpu.core_type<tc>, window_params = [{transform_indices = @transform_0, window_bounds = array<i64: 1, 32, 256>}, {pipeline_mode = #tpu.pipeline_mode<synchronous>, transform_indices = @transform_1, window_bounds = array<i64: 4, 32>}, {pipeline_mode = #tpu.pipeline_mode<synchronous>, transform_indices = @transform_2, window_bounds = array<i64: 4, 1>}, {pipeline_mode = #tpu.pipeline_mode<synchronous>, transform_indices = @transform_3, window_bounds = array<i64: 4, 32>}, {pipeline_mode = #tpu.pipeline_mode<synchronous>, transform_indices = @transform_4, window_bounds = array<i64: 4, 1>}, {pipeline_mode = #tpu.pipeline_mode<synchronous>, transform_indices = @transform_5, window_bounds = array<i64: 32, 32>}, {pipeline_mode = #tpu.pipeline_mode<synchronous>, transform_indices = @transform_6, window_bounds = array<i64: 32, 1>}, {transform_indices = @transform_7, window_bounds = array<i64: 1>}, {transform_indices = @transform_8, window_bounds = array<i64: 1, 32, 128>}]} {
    %c0_i32 = arith.constant 0 : i32
    %0 = arith.cmpi eq, %arg1, %c0_i32 : i32
    %1 = arith.extui %0 : i1 to i32
    %c0_i32_0 = arith.constant 0 : i32
    %2 = arith.cmpi ne, %1, %c0_i32_0 : i32
    scf.if %2 {
      %c0_18 = arith.constant 0 : index
      %c0_19 = arith.constant 0 : index
      %c0_20 = arith.constant 0 : index
      %37 = vector.load %arg2[%c0_18, %c0_19, %c0_20] : memref<1x32x256xf32, #tpu.memory_space<vmem>>, vector<1x32x256xf32>
      %38 = vector.shape_cast %37 : vector<1x32x256xf32> to vector<32x256xf32>
      %39 = arith.truncf %38 : vector<32x256xf32> to vector<32x256xbf16>
      %c0_21 = arith.constant 0 : index
      %c0_22 = arith.constant 0 : index
      %40 = vector.load %arg5[%c0_21, %c0_22] : memref<4x32xbf16, #tpu.memory_space<vmem>>, vector<4x32xbf16>
      %cst_23 = arith.constant dense<0.000000e+00> : vector<4x256xf32>
      %41 = tpu.matmul %40, %39, %cst_23 {dimension_numbers = #tpu.dot_dimension_numbers<[1], [0], [0], [1], [0, 0, 1, 1], [], []>} : vector<4x32xbf16>, vector<32x256xbf16>, vector<4x256xf32> -> vector<4x256xf32>
      %c0_24 = arith.constant 0 : index
      %c0_25 = arith.constant 0 : index
      %42 = vector.load %arg6[%c0_24, %c0_25] : memref<4x1xf32, #tpu.memory_space<vmem>>, vector<4x1xf32>
      %43 = vector.broadcast %42 : vector<4x1xf32> to vector<4x256xf32>
      %44 = arith.addf %41, %43 : vector<4x256xf32>
      %c0_26 = arith.constant 0 : index
      %c0_27 = arith.constant 0 : index
      %45 = vector.load %arg7[%c0_26, %c0_27] : memref<32x32xbf16, #tpu.memory_space<vmem>>, vector<32x32xbf16>
      %cst_28 = arith.constant dense<0.000000e+00> : vector<32x256xf32>
      %46 = tpu.matmul %45, %39, %cst_28 {dimension_numbers = #tpu.dot_dimension_numbers<[1], [0], [0], [1], [0, 0, 1, 1], [], []>} : vector<32x32xbf16>, vector<32x256xbf16>, vector<32x256xf32> -> vector<32x256xf32>
      %c0_29 = arith.constant 0 : index
      %c0_30 = arith.constant 0 : index
      %47 = vector.load %arg8[%c0_29, %c0_30] : memref<32x1xf32, #tpu.memory_space<vmem>>, vector<32x1xf32>
      %48 = vector.broadcast %47 : vector<32x1xf32> to vector<32x256xf32>
      %49 = arith.addf %46, %48 : vector<32x256xf32>
      %50 = arith.truncf %44 : vector<4x256xf32> to vector<4x256xbf16>
      %c0_31 = arith.constant 0 : index
      %c0_32 = arith.constant 0 : index
      %51 = vector.load %arg11[%c0_31, %c0_32] : memref<4x256xbf16, #tpu.memory_space<vmem>>, vector<4x256xbf16>
      tpu.vector_store %arg11[%c0_31, %c0_32], %50 {strides = array<i32>} : memref<4x256xbf16, #tpu.memory_space<vmem>>, vector<4x256xbf16>,
      %52 = arith.truncf %49 : vector<32x256xf32> to vector<32x256xbf16>
      %c0_33 = arith.constant 0 : index
      %c0_34 = arith.constant 0 : index
      %53 = vector.load %arg12[%c0_33, %c0_34] : memref<32x256xbf16, #tpu.memory_space<vmem>>, vector<32x256xbf16>
      tpu.vector_store %arg12[%c0_33, %c0_34], %52 {strides = array<i32>} : memref<32x256xbf16, #tpu.memory_space<vmem>>, vector<32x256xbf16>,
    } else {
    }
    %c128_i32 = arith.constant 128 : i32
    %3 = arith.muli %arg1, %c128_i32 : i32
    %4 = tpu.assume_multiple %3, 128 : i32
    %c0 = arith.constant 0 : index
    %c0_1 = arith.constant 0 : index
    %5 = arith.index_cast %4 : i32 to index
    %6 = vector.load %arg2[%c0, %c0_1, %5] : memref<1x32x256xf32, #tpu.memory_space<vmem>>, vector<1x32x128xf32>
    %7 = vector.shape_cast %6 : vector<1x32x128xf32> to vector<32x128xf32>
    %c0_2 = arith.constant 0 : index
    %c0_3 = arith.constant 0 : index
    %8 = vector.load %arg3[%c0_2, %c0_3] : memref<4x32xbf16, #tpu.memory_space<vmem>>, vector<4x32xbf16>
    %9 = arith.truncf %7 : vector<32x128xf32> to vector<32x128xbf16>
    %cst = arith.constant dense<0.000000e+00> : vector<4x128xf32>
    %10 = tpu.matmul %8, %9, %cst {dimension_numbers = #tpu.dot_dimension_numbers<[1], [0], [0], [1], [0, 0, 1, 1], [], []>} : vector<4x32xbf16>, vector<32x128xbf16>, vector<4x128xf32> -> vector<4x128xf32>
    %c0_4 = arith.constant 0 : index
    %c0_5 = arith.constant 0 : index
    %11 = vector.load %arg4[%c0_4, %c0_5] : memref<4x1xf32, #tpu.memory_space<vmem>>, vector<4x1xf32>
    %12 = vector.broadcast %11 : vector<4x1xf32> to vector<4x128xf32>
    %13 = arith.addf %10, %12 : vector<4x128xf32>
    %14 = arith.truncf %13 : vector<4x128xf32> to vector<4x128xbf16>
    %c0_6 = arith.constant 0 : index
    %c0_7 = arith.constant 0 : index
    %15 = vector.load %arg11[%c0_6, %c0_7] : memref<4x256xbf16, #tpu.memory_space<vmem>>, vector<4x256xbf16>
    %cst_8 = arith.constant dense<0.000000e+00> : vector<128x256xf32>
    %16 = tpu.matmul %14, %15, %cst_8 {dimension_numbers = #tpu.dot_dimension_numbers<[0], [0], [1], [1], [0, 1, 1, 1], [], []>} : vector<4x128xbf16>, vector<4x256xbf16>, vector<128x256xf32> -> vector<128x256xf32>
    %cst_9 = arith.constant dense<0xFF800000> : vector<128xf32>
    %17 = vector.multi_reduction <maximumf>, %16, %cst_9 [1] : vector<128x256xf32> to vector<128xf32>
    %18 = vector.shape_cast %17 : vector<128xf32> to vector<128x1xf32>
    %19 = vector.broadcast %18 : vector<128x1xf32> to vector<128x256xf32>
    %20 = arith.subf %16, %19 : vector<128x256xf32>
    %21 = math.exp %20 : vector<128x256xf32>
    %cst_10 = arith.constant dense<0.000000e+00> : vector<128xf32>
    %22 = vector.multi_reduction <add>, %21, %cst_10 [1] : vector<128x256xf32> to vector<128xf32>
    %23 = vector.shape_cast %22 : vector<128xf32> to vector<128x1xf32>
    %24 = tpu.reciprocal %23 {approx = true} : vector<128x1xf32> -> vector<128x1xf32>
    %25 = vector.broadcast %24 : vector<128x1xf32> to vector<128x256xf32>
    %26 = arith.mulf %21, %25 : vector<128x256xf32>
    %c0_11 = arith.constant 0 : index
    %c0_12 = arith.constant 0 : index
    %27 = vector.load %arg12[%c0_11, %c0_12] : memref<32x256xbf16, #tpu.memory_space<vmem>>, vector<32x256xbf16>
    %28 = arith.truncf %26 : vector<128x256xf32> to vector<128x256xbf16>
    %cst_13 = arith.constant dense<0.000000e+00> : vector<32x128xf32>
    %29 = tpu.matmul %27, %28, %cst_13 {dimension_numbers = #tpu.dot_dimension_numbers<[1], [1], [0], [0], [0, 0, 1, 0], [], []>} : vector<32x256xbf16>, vector<128x256xbf16>, vector<32x128xf32> -> vector<32x128xf32>
    %c0_14 = arith.constant 0 : index
    %30 = memref.load %arg9[%c0_14] : memref<1xf32, #tpu.memory_space<smem>>
    %31 = vector.broadcast %30 : f32 to vector<32x128xf32>
    %32 = arith.mulf %31, %29 : vector<32x128xf32>
    %33 = arith.addf %32, %7 : vector<32x128xf32>
    %c0_15 = arith.constant 0 : index
    %c0_16 = arith.constant 0 : index
    %c0_17 = arith.constant 0 : index
    %34 = vector.load %arg10[%c0_15, %c0_16, %c0_17] : memref<1x32x128xf32, #tpu.memory_space<vmem>>, vector<1x32x128xf32>
    %35 = vector.shape_cast %34 : vector<1x32x128xf32> to vector<32x128xf32>
    %36 = vector.shape_cast %33 : vector<32x128xf32> to vector<1x32x128xf32>
    tpu.vector_store %arg10[%c0_15, %c0_16, %c0_17], %36 {strides = array<i32>} : memref<1x32x128xf32, #tpu.memory_space<vmem>>, vector<1x32x128xf32>,
    return
  }
  func.func @transform_0(%arg0: i32, %arg1: i32) -> (i32, i32, i32) {
    %c0_i32 = arith.constant 0 : i32
    %c0_i32_0 = arith.constant 0 : i32
    %c0_i32_1 = arith.constant 0 : i32
    return %arg0, %c0_i32, %c0_i32_0 : i32, i32, i32
  }
  func.func @transform_1(%arg0: i32, %arg1: i32) -> (i32, i32) {
    %c0_i32 = arith.constant 0 : i32
    %c0_i32_0 = arith.constant 0 : i32
    %c0_i32_1 = arith.constant 0 : i32
    return %c0_i32, %c0_i32_0 : i32, i32
  }
  func.func @transform_2(%arg0: i32, %arg1: i32) -> (i32, i32) {
    %c0_i32 = arith.constant 0 : i32
    %c0_i32_0 = arith.constant 0 : i32
    %c0_i32_1 = arith.constant 0 : i32
    return %c0_i32, %c0_i32_0 : i32, i32
  }
  func.func @transform_3(%arg0: i32, %arg1: i32) -> (i32, i32) {
    %c0_i32 = arith.constant 0 : i32
    %c0_i32_0 = arith.constant 0 : i32
    %c0_i32_1 = arith.constant 0 : i32
    return %c0_i32, %c0_i32_0 : i32, i32
  }
  func.func @transform_4(%arg0: i32, %arg1: i32) -> (i32, i32) {
    %c0_i32 = arith.constant 0 : i32
    %c0_i32_0 = arith.constant 0 : i32
    %c0_i32_1 = arith.constant 0 : i32
    return %c0_i32, %c0_i32_0 : i32, i32
  }
  func.func @transform_5(%arg0: i32, %arg1: i32) -> (i32, i32) {
    %c0_i32 = arith.constant 0 : i32
    %c0_i32_0 = arith.constant 0 : i32
    %c0_i32_1 = arith.constant 0 : i32
    return %c0_i32, %c0_i32_0 : i32, i32
  }
  func.func @transform_6(%arg0: i32, %arg1: i32) -> (i32, i32) {
    %c0_i32 = arith.constant 0 : i32
    %c0_i32_0 = arith.constant 0 : i32
    %c0_i32_1 = arith.constant 0 : i32
    return %c0_i32, %c0_i32_0 : i32, i32
  }
  func.func @transform_7(%arg0: i32, %arg1: i32) -> i32 {
    %c0_i32 = arith.constant 0 : i32
    %c0_i32_0 = arith.constant 0 : i32
    return %c0_i32 : i32
  }
  func.func @transform_8(%arg0: i32, %arg1: i32) -> (i32, i32, i32) {
    %c0_i32 = arith.constant 0 : i32
    %c0_i32_0 = arith.constant 0 : i32
    return %arg0, %c0_i32, %arg1 : i32, i32, i32
  }
}

</mosaic_0001>

<bundles_post_ra>
// kernel: tpu_custom_call.1
= control target key start
LH: loop header
LB: loop body
LE: loop exit
PB: predicated region body
PF: predicated region fallthrough
CT: control target
= control target key end

     0   :  { %s2090_s0 = inlined_call_operand.hbm [shape: f32[2,32,256], index: 0, kind: input, shape index: {}]   ;;  %s2091_s1 = inlined_call_operand.vmem [shape: bf16[4,32], index: 1, kind: input, shape index: {}]   ;;  %s2092_s2 = inlined_call_operand.vmem [shape: f32[4,1], index: 2, kind: input, shape index: {}]   ;;  %s2093_s3 = inlined_call_operand.vmem [shape: bf16[4,32], index: 3, kind: input, shape index: {}]   ;;  %s2094_s4 = inlined_call_operand.vmem [shape: f32[4,1], index: 4, kind: input, shape index: {}]   ;;  %s2095_s5 = inlined_call_operand.vmem [shape: bf16[32,32], index: 5, kind: input, shape index: {}]   ;;  %s2096_s6 = inlined_call_operand.vmem [shape: f32[32,1], index: 6, kind: input, shape index: {}]   ;;  %s2097_s7 = inlined_call_operand.<no memory space> [shape: f32[1], index: 7, kind: input, shape index: {}]   ;;  %s2098_s8 = inlined_call_operand.hbm [shape: f32[2,32,256], index: 8, kind: output, shape index: {}]  }
   0x1   :  { %2106 = sst [smem:[#allocation18_spill]] %s2098_s8 }
   0x2   :  { %13 = sst [smem:[#allocation4]] %s2097_s7 }
   0x3   :  { %14 = vsyncpa [#allocation6], 0 }
   0x4   :  { %16 = vsyncpa [#allocation6 + $0x1], 0 }
   0x5   :  { %17 = vsyncpa [#allocation7], 0 }
   0x6   :  { %19 = vsyncpa [#allocation7 + $0x1], 0  ;;  %s1606_s29 = smov 0   ;;  %s1608_s30 = smov 0  }
   0x7   :  { %s1610_s9 = smov 0   ;;  %s1612_s10 = smov 0  }
   0x8   :  { %s1614_s11 = smov 0   ;;  %s1616_s12 = smov 0  }
   0x9   :  { %s1618_s13 = smov 0   ;;  %s1620_s14 = smov 0  }
   0xa   :  { %s1622_s7 = smov 0   ;;  %s1624_s15 = smov 0  }
   0xb   :  { %s1626_s16 = smov 0  }
   0xc LB: > { %2107 = sst [smem:[#allocation11_spill]] %s1541_s7  ;;  %s1116_s17 = sadd.s32 4294967295, %s1549_s16   ;;  %s1549_s16 = sphi %s1626_s16, %s25_s16   ;;  %s1545_s15 = sphi %s1624_s15, %s2125_s15   ;;  %s1541_s7 = sphi %s1622_s7, %s2124_s7   ;;  %s1537_s14 = sphi %s1620_s14, %s2123_s14   ;;  %s1533_s13 = sphi %s1618_s13, %s2122_s13   ;;  %s1529_s12 = sphi %s1616_s12, %s2131_s12   ;;  %s1525_s11 = sphi %s1614_s11, %s2130_s11   ;;  %s1521_s10 = sphi %s1612_s10, %s2129_s10   ;;  %s1517_s9 = sphi %s1610_s9, %s2128_s9   ;;  %s1513_s30 = sphi %s1608_s30, %s2127_s30   ;;  %s1509_s29 = sphi %s1606_s29, %s2126_s29  }
   0xd   : > { %2108 = sst [smem:[#allocation12_spill]] %s1545_s15  ;;  %s1117_s18 = sadd.s32 4294967294, %s1549_s16  }
   0xe   : > { %s34_s19 = sadd.s32 1, %s1541_s7  ;;  %s37_s20 = sadd.s32 1, %s1545_s15 }
   0xf   : > { %p35_p0 = scmp.ge.s32.totalorder %s34_s19, 2  ;;  %s44_s21 = sadd.s32 1, %s1529_s12 }
  0x10   : > { %p51_p1 = scmp.ne.s32.totalorder %s1529_s12, %s1525_s11  ;;  %p52_p2 = scmp.eq.s32.totalorder %s1549_s16, 0 }
  0x11   : > { %s2133_s19 = smov (%p35_p0, %s34_s19), 0  ;;  %s2135_s20 = smov (!%p35_p0, %s37_s20), %s1545_s15 }
  0x12   : > { %2109 = sst [smem:[#allocation13_spill]] %s2133_s19  ;;  %p1670_p3 = por %p52_p2, %p51_p1 }
  0x13   : > { %p57_p4 = scmp.ne.s32.totalorder %s1525_s11, %s1521_s10  ;;  %p39_p5 = scmp.ge.s32.totalorder %s2135_s20, 2 }
  0x14   : > { %p58_p6 = scmp.eq.s32.totalorder %s1116_s17, 0  ;;  %s215_s23 = ssub.s32 %s1541_s7, %s2133_s19 }
  0x15   : > { %s219_s24 = sadd.s32 1, %s1517_s9  ;;  %s2137_s20 = smov (%p39_p5, %s2135_s20), 0 }
  0x16   : > { %2111 = sst [smem:[#allocation14_spill]] %s2137_s20  ;;  %p1680_p7 = por %p58_p6, %p57_p4 }
  0x17   : > { %p229_p8 = scmp.ne.s32.totalorder %s1517_s9, %s1513_s30  ;;  %s41_s26 = ssub.s32 %s1545_s15, %s2137_s20 }
  0x18   : > { %p230_p9 = scmp.eq.s32.totalorder %s1116_s17, 3  ;;  %p42_p10 = scmp.eq.s32.totalorder %s41_s26, 0 }
  0x19   : > { %s216_s27 = sor.u32 %s215_s23, %s41_s26  ;;  %p235_p13 = scmp.ne.s32.totalorder %s1513_s30, %s1509_s29 }
  0x1a   : > { %p217_p11 = scmp.eq.s32.totalorder %s216_s27, 0  ;;  %p1688_p12 = por %p230_p9, %p229_p8 }
  0x1b   : > { %s1693_s10 = scalar_select %p42_p10, %s1529_s12, %s44_s21  }
  0x1c   : > { %s2113_s28 = scalar_select %p1688_p12, 1, 0 }
  0x1d   : > { %2115 = sst [smem:[#allocation16_spill]] %s1693_s10  ;;  %p236_p0 = scmp.eq.s32.totalorder %s1117_s18, 3 }
  0x1e   : > { %2114 = sst [smem:[#allocation15_spill]] %s2113_s28  ;;  %p1200_p1 = scmp.lt.s32.totalorder %s1549_s16, 4 }
  0x1f   : > { %s1696_s19 = scalar_select %p217_p11, %s1517_s9, %s219_s24  }
  0x20   : > { %p1701_p2 = por %p236_p0, %p235_p13  ;;  %s277_s17 = sand.u32 1, %s1529_s12  }
  0x21   : > { %2116 = sst [smem:[#allocation17_spill]] %s1696_s19  ;;  %s1120_s23 = sshll.u32 %s277_s17, 6 }
  0x22   : > { %s1181_s26 = sshll.u32 %s1545_s15, 6  ;;  %s281_s21 = scalar_lea.vmem [#allocation5], %s1120_s23 }
  0x23   : > { %s286_s28 = scalar_lea.hbm %s2090_s0, %s1181_s26  ;;  %s289_s10 = sshll.u32 %s281_s21, 4  ;;  %s290_s10 = int_to_ptr.vmem [resolvable:$true] %s289_s10 }
  0x24   : > { %s287_s8 = sshll.u32 %s286_s28, 4  ;;  %p1193_p4 = pnand %p1200_p1, %p1670_p3  ;;  %s288_s8 = int_to_ptr.hbm [resolvable:$true] %s287_s8 }
  0x25   : > { %p1123_p5 = scmp.ge.s32.totalorder %s1549_s16, 1  ;;  %s278_s18 = scalar_lea.sflag [#allocation6], %s277_s17 }
  0x26   : > { %s1551_s24 = smov 256   ;;  %s1552_s19 = smov 16  }
  0x27   : > { %1195 = dma.hbm_to_vmem [thread:$0]  (!%p1193_p4), %s288_s8, 1024, %s290_s10, %s278_s18, %s1551_s24, %s1551_s24, %s1552_s19  }
  0x28   : > { %p297_p6 = scmp.lt.s32.totalorder %s1549_s16, 5 }
  0x2a   : > { %p298_p8 = pnand %p1123_p5, %p297_p6 }
  0x2b   : > { %s303_s15 = sand.u32 (!%p298_p8), 1, %s1525_s11  }
  0x2c   : > { %301 = sbr.rel (%p298_p8) target bundleno = 1287 (0x507), region = 52  ;;  %s1124_s20 = sshll.u32 (!%p298_p8), %s303_s15, 6 }
  0x2d   : > { %s304_s26 = scalar_lea.sflag (!%p298_p8), [#allocation6], %s303_s15  ;;  %s1715_s23 = scalar_lea.vmem (!%p298_p8), [#allocation5], %s1124_s20 }
  0x31   : > { %1500 = dma.done.wait (%p1680_p7), %s304_s26, 1024  }
  0x32   : > { %1502 = vsyncadd (%p1680_p7), %s304_s26, 4294966272  ;;  %s338_s22 = sand.u32 1, %s1513_s30   ;;  %p1126_p3 = scmp.ne.s32.totalorder %s1533_s13, 0 }
  0x33   : > { %s1125_s8 = sshll.u32 %s338_s22, 5 }
  0x34   : > { %s1724_s19 = scalar_lea.vmem [#allocation8], %s1125_s8  ;;  %345 = sbr.rel (%p1126_p3) target bundleno = 229 (0xe5), region = 60 }
  0x39   : > { %v350_v0 = vld [vmem:[%s1715_s23 + $0x20] sm:$0xff]  ;;  %v352_v1 = vld [vmem:[%s1715_s23 + $0x30] sm:$0xff]  ;;  %v351_v2 = vld [vmem:[%s1715_s23 + $0x28] sm:$0xff]  ;;  %v1553_v7 = vmov 0   ;;  %vm365_vm0 = vcmask 261120   ;;  %vm480_vm1 = vcmask 1041408  }
  0x3a   : > { %v356_v3 = vpack.c.bf16 %v352_v1, %v350_v0  ;;  %v353_v4 = vld [vmem:[%s1715_s23 + $0x38] sm:$0xff]  ;;  %v346_v5 = vld [vmem:[%s1715_s23] sm:$0xff]  ;;  %v348_v6 = vld [vmem:[%s1715_s23 + $0x10] sm:$0xff]  ;;  %1297 = vset.pattern.permute.xlu0 %v1553_v7  ;;  %1298 = vset.pattern.permute.xlu1 %v1553_v7 }
  0x3b   : > { %v357_v8 = vpack.c.bf16 %v353_v4, %v351_v2  ;;  %v347_v9 = vld [vmem:[%s1715_s23 + $0x8] sm:$0xff]  ;;  %v349_v10 = vld [vmem:[%s1715_s23 + $0x18] sm:$0xff]  ;;  %1299 = vset.pattern.permute.xlu2 %v1553_v7  ;;  %v354_v11 = vpack.c.bf16 %v348_v6, %v346_v5  ;;  %v359_v12 = vld [vmem:[%s2094_s4] sm:$0xf] }
  0x3c   : > { %445 = vmatpush.bf16.msra.mxu2 %v356_v3  ;;  %375 = vmatpush.bf16.msra.mxu0 %v356_v3  ;;  %v355_v13 = vpack.c.bf16 %v349_v10, %v347_v9  ;;  %v400_v14 = vld [vmem:[%s2096_s6 + $0x8] sm:$0xff]  ;;  %v402_v15 = vld [vmem:[%s2096_s6 + $0x18] sm:$0xff]  ;;  %v1182_v16 = vld [vmem:[%s2095_s5] sm:$0xff] }
  0x3d   : > { %464 = vmatpush.bf16.msra.mxu3 %v357_v8  ;;  %362 = vperm.xlu0 %1297, %v359_v12   ;;  %v358_v17 = vld [vmem:[%s2093_s3] sm:$0x3]  ;;  %v401_v19 = vld [vmem:[%s2096_s6 + $0x10] sm:$0xff]  ;;  %v1183_v20 = vld [vmem:[%s2095_s5 + $0x8] sm:$0xff] }
  0x3e   : > { %388 = vmatpush.bf16.msra.mxu1 %v357_v8  ;;  %410 = vperm.xlu1 %1298, %v400_v14   ;;  %v399_v18 = vld [vmem:[%s2096_s6] sm:$0xff] }
  0x3f   : > { %420 = vperm.xlu2 %1299, %v402_v15  }
  0x40   : > { %446 = vmatpush.bf16.msra.mxu2 %v354_v11  ;;  %376 = vmatpush.bf16.msra.mxu0 %v354_v11 }
  0x41   : > { %465 = vmatpush.bf16.msra.mxu3 %v355_v13 }
  0x42   : > { %389 = vmatpush.bf16.msra.mxu1 %v355_v13 }
  0x43   : > { %1137 = vmatmul.msk.bf16.vlgmr.msra.gmra.mxu2 %vm365_vm0, %v1182_v16  ;;  %1127 = vmatmul.msk.bf16.vlgmr.msra.gmra.mxu0 %vm365_vm0, %v358_v17 }
  0x44   : > { %1139 = vmatmul.msk.bf16.vlgmr.msra.gmra.mxu3 %vm365_vm0, %v1182_v16 }
  0x45   : > { %405 = vperm.xlu0 %1297, %v399_v18   ;;  %1128 = vmatmul.msk.bf16.vlgmr.msra.gmra.mxu1 %vm365_vm0, %v358_v17 }
  0x46   : > { %415 = vperm.xlu1 %1298, %v401_v19  }
  0x53   : > { %1138 = vmatmul.msk.bf16.gmra.mxu2 %vm365_vm0, %v1183_v20 }
  0x54   : > { %1140 = vmatmul.msk.bf16.gmra.mxu3 %vm365_vm0, %v1183_v20 }
  0x99   : > { %v421_v49 = vpop.permute.xlu2 %420 }
  0xaf   : > { %v363_v21 = vpop.permute.xlu0 %362 }
  0xb0   : > { %v411_v36 = vpop.permute.xlu1 %410 }
  0xb7   : > { %v406_v26 = vpop.permute.xlu0 %405 }
  0xb8   : > { %v416_v43 = vpop.permute.xlu1 %415 }
  0xc0   : > { %v378_v22 = vpop.f32.mrf.mxu0 }
  0xc1   : > { %v379_v23 = vadd.f32 %v378_v22, %v363_v21 }
  0xc2   : > { %v391_v24 = vpop.f32.mrf.mxu1 }
  0xc3   : > { %v392_v25 = vadd.f32 %v391_v24, %v363_v21 }
  0xc5   : > { %v477_v27 = vpack.c.bf16 %v392_v25, %v379_v23 }
  0xc6   : > { %v448_v28 = vpop.f32.mrf.mxu2 }
  0xc7   : > { %v449_v29 = vadd.f32 %v448_v28, %v406_v26  ;;  %v467_v30 = vpop.f32.mrf.mxu3  ;;  %v479_v31 = vrot.slane %v477_v27, 2 }
  0xc8   : > { %v468_v32 = vadd.f32 %v467_v30, %v406_v26  ;;  %v380_v33 = vpop.f32.mrf.mxu0 }
  0xc9   : > { %v483_v34 = vsel %vm480_vm1, %v477_v27, %v479_v31 }
  0xca   : > { %v486_v35 = vpack.c.bf16 %v468_v32, %v449_v29  ;;  %485 = vst [vmem:[#allocation2] sm:$0xf] %v483_v34  ;;  %v393_v37 = vpop.f32.mrf.mxu1 }
  0xcc   : > { %490 = vst [vmem:[#allocation3] sm:$0xff] %v486_v35 }
  0xce   : > { %v450_v38 = vpop.f32.mrf.mxu2 }
  0xcf   : > { %v451_v39 = vadd.f32 %v450_v38, %v411_v36  ;;  %v469_v40 = vpop.f32.mrf.mxu3 }
  0xd0   : > { %v470_v41 = vadd.f32 %v469_v40, %v411_v36 }
  0xd2   : > { %v487_v42 = vpack.c.bf16 %v470_v41, %v451_v39 }
  0xd4   : > { %491 = vst [vmem:[#allocation3 + $0x8] sm:$0xff] %v487_v42 }
  0xd6   : > { %v453_v44 = vpop.f32.mrf.mxu2 }
  0xd7   : > { %v454_v45 = vadd.f32 %v453_v44, %v416_v43  ;;  %v472_v46 = vpop.f32.mrf.mxu3 }
  0xd8   : > { %v473_v47 = vadd.f32 %v472_v46, %v416_v43 }
  0xda   : > { %v488_v48 = vpack.c.bf16 %v473_v47, %v454_v45 }
  0xdc   : > { %492 = vst [vmem:[#allocation3 + $0x10] sm:$0xff] %v488_v48 }
  0xde   : > { %v455_v50 = vpop.f32.mrf.mxu2 }
  0xdf   : > { %v456_v51 = vadd.f32 %v455_v50, %v421_v49  ;;  %v474_v52 = vpop.f32.mrf.mxu3 }
  0xe0   : > { %v475_v53 = vadd.f32 %v474_v52, %v421_v49 }
  0xe2   : > { %v489_v54 = vpack.c.bf16 %v475_v53, %v456_v51 }
  0xe4   : > { %493 = vst [vmem:[#allocation3 + $0x18] sm:$0xff] %v489_v54 }
  0xe5 PF: > { %s1141_s17 = sshll.u32 %s1533_s13, 7  ;;  %v1554_v55 = vmov 0   ;;  %v506_v56 = vld [vmem:[%s2092_s2] sm:$0xf]  ;;  %vm512_vm2 = vcmask 261120   ;;  %vm576_vm3 = vcmask 1041408  }
  0xe6   : > { %s495_s27 = sshra.s32 %s1141_s17, 7  ;;  %1300 = vset.pattern.permute.xlu0 %v1554_v55  ;;  %v503_v63 = vld [vmem:[%s2091_s1] sm:$0x3]  ;;  %v530_v0 = vld [vmem:[#allocation2] sm:$0xf]  ;;  %vm551_vm4 = vcmask 31744  }
  0xe7   : > { %s1142_s24 = sshll.u32 %s495_s27, 3  ;;  %509 = vperm.xlu0 %1300, %v506_v56   ;;  %548 = vst [vmem:[#allocation1] ss:$4 sm:$0xff] %v530_v0  ;;  %s1177_s15 = sshll.u32 %s1537_s14, 3 }
  0xe8   : > { %s498_s20 = scalar_lea.vmem %s1715_s23, %s1142_s24 [#allocation5]  ;;  %s997_s23 = sld [smem:[#allocation4]] }
  0xe9   : > { %v1764_v57 = vld [vmem:[%s498_s20 + $0x20] sm:$0xff]  ;;  %v1766_v58 = vld [vmem:[%s498_s20 + $0x30] sm:$0xff]  ;;  %s1022_s25 = sadd.s32 %s1533_s13, %s1177_s15  ;;  %s2118_s27 = sld [smem:[#allocation18_spill]] }
  0xea   : > { %v1768_v59 = vld [vmem:[%s498_s20] sm:$0xff]  ;;  %v505_v60 = vpack.c.bf16 %v1766_v58, %v1764_v57  ;;  %v1772_v61 = vld [vmem:[%s498_s20 + $0x10] sm:$0xff]  ;;  %s1178_s28 = sshll.u32 %s1022_s25, 3  ;;  %s1025_s14 = sshll.u32 %s1724_s19, 4  ;;  %s1026_s14 = int_to_ptr.vmem [resolvable:$true] %s1025_s14 }
  0xeb   : > { %v504_v62 = vpack.c.bf16 %v1772_v61, %v1768_v59  ;;  %s1012_s13 = scalar_lea.sflag [#allocation7], %s338_s22 }
  0xec   : > { %522 = vmatpush.bf16.msra.mxu0 %v505_v60 }
  0xee   : > { %v549_v1 = vld.sshfl [vmem:[#allocation1] sm:$0xff pattern:$0x73625140]  ;;  %v550_v2 = vld.sshfl [vmem:[#allocation1 + $0x8] sm:$0xff pattern:$0x73625140] }
  0xef   : > { %v577_v3 = vsel %vm576_vm3, %v549_v1, 0  ;;  %v579_v4 = vsel %vm576_vm3, %v550_v2, 0  ;;  %s1024_s21 = scalar_lea.hbm %s2118_s27, %s1178_s28  ;;  %s1447_s15 = scalar_lea.hbm %s2118_s27, 128 }
  0xf0   : > { %523 = vmatpush.bf16.msra.mxu0 %v504_v62  ;;  %588 = vmatpush.bf16.msra.mxu1 %v577_v3  ;;  %s1027_s24 = sshll.u32 %s1024_s21, 4  ;;  %s1028_s24 = int_to_ptr.hbm [resolvable:$true] %s1027_s24 }
  0xf1   : > { %637 = vmatpush.bf16.msra.mxu2 %v579_v4  ;;  %s1441_s20 = sshra.s32 %s1028_s24, 4  ;;  %s1442_s20 = int_to_ptr.hbm [resolvable:$true] %s1441_s20 }
  0xf2   : > { %s1443_s26 = scalar_lea.hbm %s1442_s20, 32  ;;  %p1448_p11 = scmp.lt.s32.totalorder %s1442_s20, %s2118_s27 }
  0xf3   : > { %1143 = vmatmul.msk.bf16.vlgmr.msra.gmra.mxu0 %vm512_vm2, %v503_v63  ;;  %p1444_p7 = scmp.ne.s32.totalorder %s1442_s20, %s1443_s26  ;;  %p1449_p13 = scmp.lt.s32.totalorder %s1447_s15, %s1443_s26 }
  0xf5   : > { %p1445_p9 = pnand %p1444_p7, %p1688_p12  ;;  %p1450_p0 = por %p1449_p13, %p1448_p11 }
  0xf7   : > { %p1446_p10 = pneg %p1445_p9 }
  0xf9   : > { %p1451_p1 = pnand %p1450_p0, %p1446_p10 }
 0x159   : > { %v510_v5 = vpop.permute.xlu0 %509 }
 0x170   : > { %v525_v6 = vpop.f32.mrf.mxu0 }
 0x171   : > { %v526_v7 = vadd.f32 %v525_v6, %v510_v5 }
 0x173   : > { %v529_v8 = vpack.c.bf16 %v526_v7, %v526_v7 }
 0x175   : > { %531 = vxpose.xlu0.c.b16.start.end [1/1] (short) %v529_v8, 128 }
 0x178   : > { %v527_v9 = vpop.f32.mrf.mxu0 }
 0x221   : > { %v539_v10 = vpop.trf.xlu0 }
 0x222   : > { %1144 = vmatmul.msk.bf16.vlgmr.msra.gmra.mxu1 %vm551_vm4, %v539_v10  ;;  %1152 = vmatmul.msk.bf16.vlgmr.msra.gmra.mxu2 %vm551_vm4, %v539_v10 }
 0x231   : > { %v540_v11 = vpop.trf.xlu0 }
 0x232   : > { %1145 = vmatmul.msk.bf16.gmra.mxu1 %vm551_vm4, %v540_v11  ;;  %1153 = vmatmul.msk.bf16.gmra.mxu2 %vm551_vm4, %v540_v11 }
 0x241   : > { %v541_v12 = vpop.trf.xlu0 }
 0x242   : > { %1146 = vmatmul.msk.bf16.gmra.mxu1 %vm551_vm4, %v541_v12  ;;  %1154 = vmatmul.msk.bf16.gmra.mxu2 %vm551_vm4, %v541_v12 }
 0x251   : > { %v542_v13 = vpop.trf.xlu0 }
 0x252   : > { %1147 = vmatmul.msk.bf16.gmra.mxu1 %vm551_vm4, %v542_v13  ;;  %1155 = vmatmul.msk.bf16.gmra.mxu2 %vm551_vm4, %v542_v13 }
 0x261   : > { %v543_v14 = vpop.trf.xlu0 }
 0x262   : > { %1148 = vmatmul.msk.bf16.gmra.mxu1 %vm551_vm4, %v543_v14  ;;  %1156 = vmatmul.msk.bf16.gmra.mxu2 %vm551_vm4, %v543_v14 }
 0x271   : > { %v544_v15 = vpop.trf.xlu0 }
 0x272   : > { %1149 = vmatmul.msk.bf16.gmra.mxu1 %vm551_vm4, %v544_v15  ;;  %1157 = vmatmul.msk.bf16.gmra.mxu2 %vm551_vm4, %v544_v15 }
 0x281   : > { %v545_v16 = vpop.trf.xlu0 }
 0x282   : > { %1150 = vmatmul.msk.bf16.gmra.mxu1 %vm551_vm4, %v545_v16  ;;  %1158 = vmatmul.msk.bf16.gmra.mxu2 %vm551_vm4, %v545_v16 }
 0x291   : > { %v546_v17 = vpop.trf.xlu0 }
 0x292   : > { %1151 = vmatmul.msk.bf16.gmra.mxu1 %vm551_vm4, %v546_v17  ;;  %1159 = vmatmul.msk.bf16.gmra.mxu2 %vm551_vm4, %v546_v17 }
 0x29f   : > { %v1795_v18 = vpop.f32.mrf.mxu1 }
 0x2a5   : > { %v1797_v19 = vpop.f32.mrf.mxu2 }
 0x2a6   : > { %v679_v1 = vmax.f32 %v1795_v18, %v1797_v19 }
 0x2a7   : > { %v1799_v20 = vpop.f32.mrf.mxu1 }
 0x2ad   : > { %v1801_v21 = vpop.f32.mrf.mxu2 }
 0x2ae   : > { %v682_v5 = vmax.f32 %v1799_v20, %v1801_v21 }
 0x2af   : > { %v1803_v22 = vpop.f32.mrf.mxu1 }
 0x2b5   : > { %v1805_v23 = vpop.f32.mrf.mxu2 }
 0x2b6   : > { %v685_v24 = vmax.f32 %v1803_v22, %v1805_v23 }
 0x2b7   : > { %v1809_v25 = vpop.f32.mrf.mxu1 }
 0x2b8   : > { %686 = vmax.xlane.f32.xlu0 %v685_v24 }
 0x2bd   : > { %v1811_v26 = vpop.f32.mrf.mxu2 }
 0x2be   : > { %v688_v4 = vmax.f32 %v1809_v25, %v1811_v26 }
 0x2bf   : > { %v1813_v27 = vpop.f32.mrf.mxu1 }
 0x2c5   : > { %v1815_v28 = vpop.f32.mrf.mxu2 }
 0x2c6   : > { %v691_v3 = vmax.f32 %v1813_v27, %v1815_v28 }
 0x2c7   : > { %v1817_v29 = vpop.f32.mrf.mxu1 }
 0x2cd   : > { %v1819_v30 = vpop.f32.mrf.mxu2 }
 0x2ce   : > { %v694_v63 = vmax.f32 %v1817_v29, %v1819_v30 }
 0x2cf   : > { %v1821_v31 = vpop.f32.mrf.mxu1 }
 0x2d5   : > { %v1823_v32 = vpop.f32.mrf.mxu2 }
 0x2d6   : > { %v697_v2 = vmax.f32 %v1821_v31, %v1823_v32 }
 0x2d7   : > { %v1825_v33 = vpop.f32.mrf.mxu1 }
 0x2dd   : > { %v1827_v34 = vpop.f32.mrf.mxu2 }
 0x2de   : > { %v700_v60 = vmax.f32 %v1825_v33, %v1827_v34 }
 0x2df   : > { %v1829_v35 = vpop.f32.mrf.mxu1 }
 0x2e5   : > { %v1831_v36 = vpop.f32.mrf.mxu2 }
 0x2e6   : > { %v703_v0 = vmax.f32 %v1829_v35, %v1831_v36 }
 0x2e7   : > { %v1833_v37 = vpop.f32.mrf.mxu1 }
 0x2ed   : > { %v1835_v38 = vpop.f32.mrf.mxu2 }
 0x2ee   : > { %v706_v56 = vmax.f32 %v1833_v37, %v1835_v38 }
 0x2ef   : > { %v1837_v39 = vpop.f32.mrf.mxu1 }
 0x2f5   : > { %v1839_v40 = vpop.f32.mrf.mxu2 }
 0x2f6   : > { %v709_v62 = vmax.f32 %v1837_v39, %v1839_v40 }
 0x2f7   : > { %v1841_v41 = vpop.f32.mrf.mxu1 }
 0x2fd   : > { %v1843_v42 = vpop.f32.mrf.mxu2 }
 0x2fe   : > { %v712_v51 = vmax.f32 %v1841_v41, %v1843_v42 }
 0x2ff   : > { %v620_v43 = vpop.f32.mrf.mxu1 }
 0x305   : > { %v669_v44 = vpop.f32.mrf.mxu2 }
 0x306   : > { %v715_v45 = vmax.f32 %v620_v43, %v669_v44 }
 0x307   : > { %v1845_v46 = vpop.f32.mrf.mxu1 }
 0x308   : > { %716 = vmax.xlane.f32.xlu2 %v715_v45 }
 0x30d   : > { %v1847_v47 = vpop.f32.mrf.mxu2 }
 0x30e   : > { %v718_v48 = vmax.f32 %v1845_v46, %v1847_v47 }
 0x30f   : > { %v625_v49 = vpop.f32.mrf.mxu1 }
 0x310   : > { %719 = vmax.xlane.f32.xlu2 %v718_v48 }
 0x315   : > { %v674_v50 = vpop.f32.mrf.mxu2 }
 0x316   : > { %v721_v52 = vmax.f32 %v625_v49, %v674_v50 }
 0x317   : > { %v627_v53 = vpop.f32.mrf.mxu1 }
 0x318   : > { %713 = vmax.xlane.f32.xlu2 %v712_v51  ;;  %722 = vmax.xlane.f32.xlu1 %v721_v52 }
 0x31d   : > { %v676_v54 = vpop.f32.mrf.mxu2 }
 0x31e   : > { %v724_v55 = vmax.f32 %v627_v53, %v676_v54 }
 0x320   : > { %707 = vmax.xlane.f32.xlu2 %v706_v56  ;;  %725 = vmax.xlane.f32.xlu1 %v724_v55 }
 0x328   : > { %701 = vmax.xlane.f32.xlu2 %v700_v60  ;;  %710 = vmax.xlane.f32.xlu1 %v709_v62 }
 0x330   : > { %695 = vmax.xlane.f32.xlu2 %v694_v63  ;;  %704 = vmax.xlane.f32.xlu1 %v703_v0 }
 0x338   : > { %680 = vmax.xlane.f32.xlu2 %v679_v1  ;;  %698 = vmax.xlane.f32.xlu1 %v697_v2 }
 0x340   : > { %692 = vmax.xlane.f32.xlu1 %v691_v3 }
 0x348   : > { %689 = vmax.xlane.f32.xlu1 %v688_v4 }
 0x350   : > { %683 = vmax.xlane.f32.xlu1 %v682_v5 }
 0x37b   : > { %v717_v6 = vpop.xlane.xlu2 %716 }
 0x37c   : > { %v751_v13 = vsub.f32 %v620_v43, %v717_v6  ;;  %v752_v14 = vsub.f32 %v669_v44, %v717_v6 }
 0x37e   : > { %v807_v17 = vmul.f32 1.442695, %v751_v13  ;;  %v809_v48 = vmul.f32 1.442695, %v752_v14 }
 0x383   : > { %v720_v7 = vpop.xlane.xlu2 %719 }
 0x384   : > { %v754_v43 = vsub.f32 %v1847_v47, %v720_v7 }
 0x386   : > { %v813_v62 = vmul.f32 1.442695, %v754_v43 }
 0x38b   : > { %v723_v8 = vpop.xlane.xlu1 %722  ;;  %v714_v15 = vpop.xlane.xlu2 %713 }
 0x38c   : > { %v755_v9 = vsub.f32 %v625_v49, %v723_v8  ;;  %v756_v10 = vsub.f32 %v674_v50, %v723_v8  ;;  %v753_v49 = vsub.f32 %v1845_v46, %v720_v7  ;;  %v749_v3 = vsub.f32 %v1841_v41, %v714_v15 }
 0x38e   : > { %v815_v11 = vmul.f32 1.442695, %v755_v9  ;;  %v817_v12 = vmul.f32 1.442695, %v756_v10  ;;  %v803_v7 = vmul.f32 1.442695, %v749_v3 }
 0x390   : > { %1301 = vpow2.f32 %v815_v11 }
 0x391   : > { %1303 = vpow2.f32 %v817_v12 }
 0x392   : > { %1305 = vpow2.f32 %v807_v17 }
 0x393   : > { %v726_v16 = vpop.xlane.xlu1 %725  ;;  %1307 = vpow2.f32 %v809_v48  ;;  %v708_v63 = vpop.xlane.xlu2 %707 }
 0x394   : > { %v757_v24 = vsub.f32 %v627_v53, %v726_v16  ;;  %v758_v45 = vsub.f32 %v676_v54, %v726_v16  ;;  %v811_v54 = vmul.f32 1.442695, %v753_v49 }
 0x396   : > { %v819_v51 = vmul.f32 1.442695, %v757_v24  ;;  %v821_v52 = vmul.f32 1.442695, %v758_v45  ;;  %v1873_v55 = vpop.eup %1301 }
 0x397   : > { %v1876_v50 = vpop.eup %1303 }
 0x398   : > { %1309 = vpow2.f32 %v819_v51  ;;  %v865_v44 = vadd.f32 %v1876_v50, %v1873_v55  ;;  %v1883_v46 = vpop.eup %1305 }
 0x399   : > { %1311 = vpow2.f32 %v821_v52  ;;  %v1885_v1 = vpop.eup %1307 }
 0x39a   : > { %866 = vadd.xlane.f32.xlu2 %v865_v44  ;;  %1313 = vpow2.f32 %v811_v54 }
 0x39b   : > { %v711_v53 = vpop.xlane.xlu1 %710  ;;  %1315 = vpow2.f32 %v813_v62  ;;  %v702_v12 = vpop.xlane.xlu2 %701 }
 0x39c   : > { %v747_v56 = vsub.f32 %v1837_v39, %v711_v53  ;;  %v748_v60 = vsub.f32 %v1839_v40, %v711_v53  ;;  %v750_v39 = vsub.f32 %v1843_v42, %v714_v15  ;;  %v859_v40 = vadd.f32 %v1885_v1, %v1883_v46  ;;  %v687_v62 = vpop.xlane.xlu0 %686 }
 0x39d   : > { %v745_v15 = vsub.f32 %v1833_v37, %v708_v63  ;;  %v742_v44 = vsub.f32 %v1827_v34, %v702_v12 }
 0x39e   : > { %v799_v0 = vmul.f32 1.442695, %v747_v56  ;;  %v801_v47 = vmul.f32 1.442695, %v748_v60  ;;  %v1887_v2 = vpop.eup %1309  ;;  %v805_v41 = vmul.f32 1.442695, %v750_v39  ;;  %v731_v39 = vsub.f32 %v1803_v22, %v687_v62 }
 0x39f   : > { %v1890_v4 = vpop.eup %1311  ;;  %v795_v45 = vmul.f32 1.442695, %v745_v15 }
 0x3a0   : > { %1317 = vpow2.f32 %v799_v0  ;;  %v868_v5 = vadd.f32 %v1890_v4, %v1887_v2  ;;  %v1899_v10 = vpop.eup %1313 }
 0x3a1   : > { %1319 = vpow2.f32 %v801_v47  ;;  %v1901_v11 = vpop.eup %1315 }
 0x3a2   : > { %860 = vadd.xlane.f32.xlu2 %v859_v40  ;;  %869 = vadd.xlane.f32.xlu1 %v868_v5  ;;  %1321 = vpow2.f32 %v803_v7  ;;  %v732_v7 = vsub.f32 %v1805_v23, %v687_v62 }
 0x3a3   : > { %v705_v6 = vpop.xlane.xlu1 %704  ;;  %1323 = vpow2.f32 %v805_v41 }
 0x3a4   : > { %v743_v8 = vsub.f32 %v1829_v35, %v705_v6  ;;  %v744_v9 = vsub.f32 %v1831_v36, %v705_v6  ;;  %v746_v35 = vsub.f32 %v1835_v38, %v708_v63  ;;  %v862_v36 = vadd.f32 %v1901_v11, %v1899_v10 }
 0x3a5   : > { %v741_v38 = vsub.f32 %v1825_v33, %v702_v12  ;;  %v789_v63 = vmul.f32 1.442695, %v742_v44  ;;  %v769_v12 = vmul.f32 1.442695, %v732_v7 }
 0x3a6   : > { %v791_v42 = vmul.f32 1.442695, %v743_v8  ;;  %v793_v13 = vmul.f32 1.442695, %v744_v9  ;;  %v1903_v14 = vpop.eup %1317  ;;  %v797_v37 = vmul.f32 1.442695, %v746_v35 }
 0x3a7   : > { %v1906_v16 = vpop.eup %1319  ;;  %v787_v60 = vmul.f32 1.442695, %v741_v38  ;;  %v767_v9 = vmul.f32 1.442695, %v731_v39 }
 0x3a8   : > { %1325 = vpow2.f32 %v791_v42  ;;  %v853_v17 = vadd.f32 %v1906_v16, %v1903_v14  ;;  %v1915_v52 = vpop.eup %1321 }
 0x3a9   : > { %1327 = vpow2.f32 %v793_v13  ;;  %v1918_v43 = vpop.eup %1323 }
 0x3aa   : > { %863 = vadd.xlane.f32.xlu1 %v862_v36  ;;  %854 = vadd.xlane.f32.xlu2 %v853_v17  ;;  %1329 = vpow2.f32 %v795_v45 }
 0x3ab   : > { %v699_v24 = vpop.xlane.xlu1 %698  ;;  %1331 = vpow2.f32 %v797_v37 }
 0x3ac   : > { %v739_v48 = vsub.f32 %v1821_v31, %v699_v24  ;;  %v740_v51 = vsub.f32 %v1823_v32, %v699_v24  ;;  %v696_v31 = vpop.xlane.xlu2 %695  ;;  %v856_v32 = vadd.f32 %v1918_v43, %v1915_v52 }
 0x3ad   : > { %v737_v41 = vsub.f32 %v1817_v29, %v696_v31 }
 0x3ae   : > { %v783_v49 = vmul.f32 1.442695, %v739_v48  ;;  %v785_v53 = vmul.f32 1.442695, %v740_v51  ;;  %v1921_v54 = vpop.eup %1325 }
 0x3af   : > { %v1923_v56 = vpop.eup %1327  ;;  %v779_v35 = vmul.f32 1.442695, %v737_v41 }
 0x3b0   : > { %1333 = vpow2.f32 %v783_v49  ;;  %v847_v33 = vadd.f32 %v1923_v56, %v1921_v54  ;;  %v1931_v3 = vpop.eup %1329 }
 0x3b1   : > { %1335 = vpow2.f32 %v785_v53  ;;  %v1934_v6 = vpop.eup %1331 }
 0x3b2   : > { %857 = vadd.xlane.f32.xlu1 %v856_v32  ;;  %848 = vadd.xlane.f32.xlu2 %v847_v33  ;;  %1337 = vpow2.f32 %v787_v60  ;;  %v850_v22 = vadd.f32 %v1934_v6, %v1931_v3 }
 0x3b3   : > { %v693_v34 = vpop.xlane.xlu1 %692  ;;  %1339 = vpow2.f32 %v789_v63 }
 0x3b4   : > { %v735_v0 = vsub.f32 %v1813_v27, %v693_v34  ;;  %v736_v47 = vsub.f32 %v1815_v28, %v693_v34  ;;  %v738_v28 = vsub.f32 %v1819_v30, %v696_v31  ;;  %v681_v23 = vpop.xlane.xlu2 %680 }
 0x3b5   : > { %v727_v17 = vsub.f32 %v1795_v18, %v681_v23  ;;  %v728_v45 = vsub.f32 %v1797_v19, %v681_v23 }
 0x3b6   : > { %v775_v40 = vmul.f32 1.442695, %v735_v0  ;;  %v777_v5 = vmul.f32 1.442695, %v736_v47  ;;  %v1937_v8 = vpop.eup %1333  ;;  %v781_v36 = vmul.f32 1.442695, %v738_v28 }
 0x3b7   : > { %v1940_v27 = vpop.eup %1335  ;;  %v759_v38 = vmul.f32 1.442695, %v727_v17  ;;  %v761_v44 = vmul.f32 1.442695, %v728_v45 }
 0x3b8   : > { %1341 = vpow2.f32 %v775_v40  ;;  %v841_v42 = vadd.f32 %v1940_v27, %v1937_v8  ;;  %v1947_v15 = vpop.eup %1337 }
 0x3b9   : > { %1343 = vpow2.f32 %v777_v5  ;;  %v1949_v29 = vpop.eup %1339 }
 0x3ba   : > { %851 = vadd.xlane.f32.xlu1 %v850_v22  ;;  %842 = vadd.xlane.f32.xlu2 %v841_v42  ;;  %1345 = vpow2.f32 %v767_v9  ;;  %v844_v49 = vadd.f32 %v1949_v29, %v1947_v15 }
 0x3bb   : > { %v690_v13 = vpop.xlane.xlu1 %689  ;;  %1347 = vpow2.f32 %v769_v12 }
 0x3bc   : > { %1349 = vpow2.f32 %v779_v35  ;;  %v733_v48 = vsub.f32 %v1809_v25, %v690_v13  ;;  %v734_v51 = vsub.f32 %v1811_v26, %v690_v13 }
 0x3bd   : > { %1351 = vpow2.f32 %v781_v36 }
 0x3be   : > { %v1951_v30 = vpop.eup %1341  ;;  %v771_v53 = vmul.f32 1.442695, %v733_v48  ;;  %v773_v31 = vmul.f32 1.442695, %v734_v51  ;;  %1353 = vpow2.f32 %v759_v38 }
 0x3bf   : > { %v1954_v24 = vpop.eup %1343  ;;  %1355 = vpow2.f32 %v761_v44 }
 0x3c0   : > { %v835_v37 = vadd.f32 %v1954_v24, %v1951_v30  ;;  %v1963_v18 = vpop.eup %1345  ;;  %1357 = vpow2.f32 %v771_v53 }
 0x3c1   : > { %v1965_v19 = vpop.eup %1347  ;;  %1359 = vpow2.f32 %v773_v31 }
 0x3c2   : > { %845 = vadd.xlane.f32.xlu1 %v844_v49  ;;  %836 = vadd.xlane.f32.xlu2 %v835_v37  ;;  %v1967_v60 = vpop.eup %1349  ;;  %v829_v63 = vadd.f32 %v1965_v19, %v1963_v18 }
 0x3c3   : > { %v684_v25 = vpop.xlane.xlu1 %683  ;;  %v1969_v32 = vpop.eup %1351 }
 0x3c4   : > { %v729_v26 = vsub.f32 %v1799_v20, %v684_v25  ;;  %v730_v33 = vsub.f32 %v1801_v21, %v684_v25  ;;  %v838_v62 = vadd.f32 %v1969_v32, %v1967_v60  ;;  %v1977_v34 = vpop.eup %1353 }
 0x3c5   : > { %v1979_v47 = vpop.eup %1355 }
 0x3c6   : > { %v763_v0 = vmul.f32 1.442695, %v729_v26  ;;  %v765_v39 = vmul.f32 1.442695, %v730_v33  ;;  %v1981_v40 = vpop.eup %1357  ;;  %v823_v5 = vadd.f32 %v1979_v47, %v1977_v34 }
 0x3c7   : > { %v1983_v20 = vpop.eup %1359 }
 0x3c8   : > { %1361 = vpow2.f32 %v763_v0  ;;  %v832_v21 = vadd.f32 %v1983_v20, %v1981_v40 }
 0x3c9   : > { %1363 = vpow2.f32 %v765_v39 }
 0x3ca   : > { %839 = vadd.xlane.f32.xlu1 %v838_v62  ;;  %830 = vadd.xlane.f32.xlu2 %v829_v63 }
 0x3ce   : > { %v1989_v7 = vpop.eup %1361 }
 0x3cf   : > { %v1991_v41 = vpop.eup %1363 }
 0x3d0   : > { %v826_v28 = vadd.f32 %v1991_v41, %v1989_v7 }
 0x3d2   : > { %833 = vadd.xlane.f32.xlu1 %v832_v21  ;;  %824 = vadd.xlane.f32.xlu2 %v823_v5 }
 0x3da   : > { %827 = vadd.xlane.f32.xlu1 %v826_v28 }
 0x40d   : > { %v867_v9 = vpop.xlane.xlu2 %866 }
 0x40e   : > { %1365 = vrcp.f32 %v867_v9 }
 0x414   : > { %v1366_v12 = vpop.eup %1365 }
 0x415   : > { %v861_v22 = vpop.xlane.xlu2 %860  ;;  %v870_v42 = vpop.xlane.xlu1 %869  ;;  %v915_v36 = vmul.f32 %v1366_v12, %v1873_v55  ;;  %v916_v45 = vmul.f32 %v1366_v12, %v1876_v50 }
 0x416   : > { %1367 = vrcp.f32 %v870_v42 }
 0x417   : > { %1369 = vrcp.f32 %v861_v22 }
 0x41c   : > { %v1368_v23 = vpop.eup %1367 }
 0x41d   : > { %v855_v13 = vpop.xlane.xlu2 %854  ;;  %v864_v35 = vpop.xlane.xlu1 %863  ;;  %v917_v17 = vmul.f32 %v1368_v23, %v1887_v2  ;;  %v918_v48 = vmul.f32 %v1368_v23, %v1890_v4 }
 0x41e   : > { %1371 = vrcp.f32 %v864_v35  ;;  %v1370_v38 = vpop.eup %1369 }
 0x41f   : > { %v937_v37 = vpack.c.bf16 %v917_v17, %v915_v36  ;;  %v938_v51 = vpack.c.bf16 %v918_v48, %v916_v45  ;;  %1373 = vrcp.f32 %v855_v13  ;;  %v911_v31 = vmul.f32 %v1370_v38, %v1883_v46 }
 0x420   : > { %v912_v2 = vmul.f32 %v1370_v38, %v1885_v1 }
 0x421   : > { %959 = vmatpush.bf16.xpose.msra.mxu3 %v937_v37  ;;  %978 = vmatpush.bf16.xpose.msrb.mxu0 %v938_v51 }
 0x424   : > { %v1372_v49 = vpop.eup %1371 }
 0x425   : > { %v849_v44 = vpop.xlane.xlu2 %848  ;;  %v858_v53 = vpop.xlane.xlu1 %857  ;;  %v913_v55 = vmul.f32 %v1372_v49, %v1899_v10  ;;  %v914_v50 = vmul.f32 %v1372_v49, %v1901_v11 }
 0x426   : > { %1375 = vrcp.f32 %v858_v53  ;;  %v1374_v26 = vpop.eup %1373 }
 0x427   : > { %v935_v4 = vpack.c.bf16 %v913_v55, %v911_v31  ;;  %v936_v25 = vpack.c.bf16 %v914_v50, %v912_v2  ;;  %1377 = vrcp.f32 %v849_v44  ;;  %v907_v0 = vmul.f32 %v1374_v26, %v1903_v14 }
 0x428   : > { %v908_v10 = vmul.f32 %v1374_v26, %v1906_v16 }
 0x429   : > { %960 = vmatpush.bf16.xpose.msra.mxu3 %v935_v4  ;;  %979 = vmatpush.bf16.xpose.msrb.mxu0 %v936_v25 }
 0x42c   : > { %v1376_v33 = vpop.eup %1375 }
 0x42d   : > { %v843_v62 = vpop.xlane.xlu2 %842  ;;  %v852_v63 = vpop.xlane.xlu1 %851  ;;  %v909_v46 = vmul.f32 %v1376_v33, %v1915_v52  ;;  %v910_v1 = vmul.f32 %v1376_v33, %v1918_v43 }
 0x42e   : > { %1379 = vrcp.f32 %v852_v63  ;;  %v1378_v21 = vpop.eup %1377  ;;  %v1184_v63 = vld [vmem:[#allocation3 + $0x4] sm:$0xf] }
 0x42f   : > { %v933_v11 = vpack.c.bf16 %v909_v46, %v907_v0  ;;  %v934_v39 = vpack.c.bf16 %v910_v1, %v908_v10  ;;  %1381 = vrcp.f32 %v843_v62  ;;  %v903_v22 = vmul.f32 %v1378_v21, %v1921_v54  ;;  %v1164_v0 = vld [vmem:[#allocation3 + $0x8] sm:$0xf0]  ;;  %v1170_v1 = vld [vmem:[#allocation3 + $0x10] sm:$0xf] }
 0x430   : > { %v904_v52 = vmul.f32 %v1378_v21, %v1923_v56  ;;  %v1167_v10 = vor.u32 %v1184_v63, %v1164_v0 }
 0x431   : > { %961 = vmatpush.bf16.xpose.msra.mxu3 %v933_v11  ;;  %980 = vmatpush.bf16.xpose.msrb.mxu0 %v934_v39  ;;  %v1172_v11 = vld [vmem:[#allocation3 + $0x18] sm:$0xf0] }
 0x434   : > { %v1380_v5 = vpop.eup %1379 }
 0x435   : > { %v837_v28 = vpop.xlane.xlu2 %836  ;;  %v846_v9 = vpop.xlane.xlu1 %845  ;;  %v905_v14 = vmul.f32 %v1380_v5, %v1931_v3  ;;  %v906_v16 = vmul.f32 %v1380_v5, %v1934_v6  ;;  %v998_v5 = vstv %s997_s23 }
 0x436   : > { %1383 = vrcp.f32 %v846_v9  ;;  %v1382_v12 = vpop.eup %1381 }
 0x437   : > { %v931_v43 = vpack.c.bf16 %v905_v14, %v903_v22  ;;  %v932_v42 = vpack.c.bf16 %v906_v16, %v904_v52  ;;  %1385 = vrcp.f32 %v837_v28  ;;  %v899_v35 = vmul.f32 %v1382_v12, %v1937_v8 }
 0x438   : > { %v900_v3 = vmul.f32 %v1382_v12, %v1940_v27 }
 0x439   : > { %962 = vmatpush.bf16.xpose.msra.mxu3 %v931_v43  ;;  %981 = vmatpush.bf16.xpose.msrb.mxu0 %v932_v42 }
 0x43c   : > { %v1384_v23 = vpop.eup %1383 }
 0x43d   : > { %v840_v13 = vpop.xlane.xlu1 %839  ;;  %v901_v54 = vmul.f32 %v1384_v23, %v1947_v15  ;;  %v902_v56 = vmul.f32 %v1384_v23, %v1949_v29  ;;  %v831_v36 = vpop.xlane.xlu2 %830 }
 0x43e   : > { %1387 = vrcp.f32 %v840_v13  ;;  %v1386_v45 = vpop.eup %1385 }
 0x43f   : > { %v929_v6 = vpack.c.bf16 %v901_v54, %v899_v35  ;;  %v930_v17 = vpack.c.bf16 %v902_v56, %v900_v3  ;;  %1389 = vrcp.f32 %v831_v36  ;;  %v895_v51 = vmul.f32 %v1386_v45, %v1951_v30 }
 0x440   : > { %v896_v38 = vmul.f32 %v1386_v45, %v1954_v24 }
 0x441   : > { %963 = vmatpush.bf16.xpose.msra.mxu3 %v929_v6  ;;  %982 = vmatpush.bf16.xpose.msrb.mxu0 %v930_v17 }
 0x444   : > { %v1388_v48 = vpop.eup %1387 }
 0x445   : > { %v834_v37 = vpop.xlane.xlu1 %833  ;;  %v897_v8 = vmul.f32 %v1388_v48, %v1967_v60  ;;  %v898_v15 = vmul.f32 %v1388_v48, %v1969_v32  ;;  %v825_v49 = vpop.xlane.xlu2 %824 }
 0x446   : > { %1391 = vrcp.f32 %v834_v37  ;;  %v1390_v44 = vpop.eup %1389 }
 0x447   : > { %v927_v27 = vpack.c.bf16 %v897_v8, %v895_v51  ;;  %v928_v29 = vpack.c.bf16 %v898_v15, %v896_v38  ;;  %1393 = vrcp.f32 %v825_v49  ;;  %v891_v55 = vmul.f32 %v1390_v44, %v1963_v18 }
 0x448   : > { %v892_v60 = vmul.f32 %v1390_v44, %v1965_v19  ;;  %v1162_v19 = vld [vmem:[#allocation3] sm:$0xf] }
 0x449   : > { %964 = vmatpush.bf16.xpose.msra.mxu3 %v927_v27  ;;  %983 = vmatpush.bf16.xpose.msrb.mxu0 %v928_v29 }
 0x44c   : > { %v1392_v53 = vpop.eup %1391 }
 0x44d   : > { %v828_v31 = vpop.xlane.xlu1 %827  ;;  %v893_v30 = vmul.f32 %v1392_v53, %v1981_v40  ;;  %v894_v24 = vmul.f32 %v1392_v53, %v1983_v20  ;;  %v1394_v50 = vpop.eup %1393  ;;  %v1185_v20 = vld [vmem:[#allocation3 + $0x4] sm:$0xf0] }
 0x44e   : > { %1395 = vrcp.f32 %v828_v31  ;;  %v887_v25 = vmul.f32 %v1394_v50, %v1977_v34  ;;  %v888_v33 = vmul.f32 %v1394_v50, %v1979_v47  ;;  %v1163_v46 = vor.u32 %v1185_v20, %v1162_v19  ;;  %v1187_v34 = vld [vmem:[#allocation3 + $0x14] sm:$0xf0] }
 0x44f   : > { %v925_v32 = vpack.c.bf16 %v893_v30, %v891_v55  ;;  %v926_v2 = vpack.c.bf16 %v894_v24, %v892_v60  ;;  %v1171_v47 = vor.u32 %v1187_v34, %v1170_v1 }
 0x451   : > { %965 = vmatpush.bf16.xpose.msra.mxu3 %v925_v32  ;;  %984 = vmatpush.bf16.xpose.msrb.mxu0 %v926_v2 }
 0x454   : > { %v1396_v4 = vpop.eup %1395 }
 0x455   : > { %v889_v26 = vmul.f32 %v1396_v4, %v1989_v7  ;;  %v890_v18 = vmul.f32 %v1396_v4, %v1991_v41  ;;  %v1186_v7 = vld [vmem:[#allocation3 + $0x14] sm:$0xf] }
 0x456   : > { %v1175_v39 = vor.u32 %v1186_v7, %v1172_v11 }
 0x457   : > { %v923_v40 = vpack.c.bf16 %v889_v26, %v887_v25  ;;  %v924_v62 = vpack.c.bf16 %v890_v18, %v888_v33 }
 0x459   : > { %966 = vmatpush.bf16.xpose.msra.mxu3 %v923_v40  ;;  %985 = vmatpush.bf16.xpose.msrb.mxu0 %v924_v62 }
 0x460   : > { %967 = vmatmul.bf16.vlgmr.msra.gmra.mxu3 %v1163_v46  ;;  %986 = vmatmul.bf16.vlgmr.msrb.gmra.mxu0 %v1167_v10 }
 0x470   : > { %972 = vmatmul.bf16.gmra.mxu3 %v1171_v47  ;;  %991 = vmatmul.bf16.gmra.mxu0 %v1175_v39 }
 0x4dd   : > { %v987_v41 = vpop.f32.mrf.mxu0 }
 0x4e3   : > { %v968_v21 = vpop.f32.mrf.mxu3 }
 0x4e4   : > { %v988_v28 = vadd.f32 %v987_v41, %v968_v21 }
 0x4e5   : > { %v989_v22 = vpop.f32.mrf.mxu0 }
 0x4e6   : > { %v999_v9 = vmul.f32 %v998_v5, %v988_v28 }
 0x4e8   : > { %v1003_v14 = vadd.f32 %v999_v9, %v1768_v59 }
 0x4ea   : > { %1007 = vst [vmem:[%s1724_s19] sm:$0xff] %v1003_v14 }
 0x4eb   : > { %v970_v52 = vpop.f32.mrf.mxu3 }
 0x4ec   : > { %v990_v16 = vadd.f32 %v989_v22, %v970_v52 }
 0x4ed   : > { %v992_v12 = vpop.f32.mrf.mxu0 }
 0x4ee   : > { %v1000_v43 = vmul.f32 %v998_v5, %v990_v16 }
 0x4f0   : > { %v1004_v42 = vadd.f32 %v1000_v43, %v1772_v61 }
 0x4f2   : > { %1008 = vst [vmem:[%s1724_s19 + $0x8] sm:$0xff] %v1004_v42 }
 0x4f3   : > { %v973_v23 = vpop.f32.mrf.mxu3 }
 0x4f4   : > { %v993_v13 = vadd.f32 %v992_v12, %v973_v23 }
 0x4f5   : > { %v994_v54 = vpop.f32.mrf.mxu0 }
 0x4f6   : > { %v1001_v35 = vmul.f32 %v998_v5, %v993_v13 }
 0x4f8   : > { %v1005_v59 = vadd.f32 %v1001_v35, %v1764_v57 }
 0x4fa   : > { %1009 = vst [vmem:[%s1724_s19 + $0x10] sm:$0xff] %v1005_v59 }
 0x4fb   : > { %v975_v61 = vpop.f32.mrf.mxu3 }
 0x4fc   : > { %v995_v3 = vadd.f32 %v994_v54, %v975_v61 }
 0x4fe   : > { %v1002_v56 = vmul.f32 %v998_v5, %v995_v3 }
 0x500   : > { %v1006_v36 = vadd.f32 %v1002_v56, %v1766_v58 }
 0x502   : > { %1010 = vst [vmem:[%s1724_s19 + $0x18] sm:$0xff] %v1006_v36 }
 0x503   : > { %1454 = shalt.err (!%p1451_p1)
}
 0x504   : > { %s1555_s22 = smov 128   ;;  %s1556_s19 = smov 256  }
 0x505   : > { %s1557_s10 = smov 8  }
 0x506   : > { %1190 = dma.vmem_to_hbm [thread:$0]  (%p1688_p12), %s1026_s14, 512, %s1028_s24, %s1012_s13, %s1555_s22, %s1556_s19, %s1557_s10  }
 0x507 PF: > { %p1201_p4 = scmp.ge.s32.totalorder %s1549_s16, 2  ;;  %s1042_s17 = sand.u32 1, %s1509_s29  }
 0x508   : > { %s1043_s21 = scalar_lea.sflag [#allocation7], %s1042_s17 }
 0x509   : > { %p1197_p5 = pnand %p1201_p4, %p1701_p2 }
 0x50b   : > { %p1198_p6 = pneg %p1197_p5 }
 0x50d   : > { %1504 = dma.done.wait (%p1198_p6), %s1043_s21, 512  }
 0x50e   : > { %1506 = vsyncadd (%p1198_p6), %s1043_s21, 4294966784  ;;  %s25_s16 = sadd.s32 1, %s1549_s16   ;;  %s2120_s20 = sld [smem:[#allocation17_spill]] }
 0x50f   : > { %p22_p8 = scmp.ge.s32.totalorder %s25_s16, 6   ;;  %s2121_s18 = sld [smem:[#allocation16_spill]] }
 0x510   : > { %s2122_s13 = sld [smem:[#allocation11_spill]]  ;;  %s2126_s29 = smov %s1513_s30 }
 0x511   : > { %s2123_s14 = sld [smem:[#allocation12_spill]]  ;;  %s2127_s30 = smov %s1517_s9 }
 0x512   : > { %s2124_s7 = sld [smem:[#allocation13_spill]]  ;;  %s2129_s10 = smov %s1525_s11 }
 0x513   : > { %s2125_s15 = sld [smem:[#allocation14_spill]]  ;;  %s2130_s11 = smov %s1529_s12 }
 0x514   : > { %s2128_s9 = smov %s2120_s20  ;;  %24 = sbr.rel (!%p22_p8) target bundleno = 12 (0xc), region = 102 }
 0x515   : > { %s2131_s12 = smov %s2121_s18 }
 0x519   :  { %1049 = vsyncpa [#allocation6], 1 }
 0x51a   :  { %1051 = vsyncpa [#allocation6 + $0x1], 1 }
 0x51b   :  { %1052 = vsyncpa [#allocation7], 1 }
 0x51c   :  { %1054 = vsyncpa [#allocation7 + $0x1], 1 }

</bundles_post_ra>
